<compile_context>
chip_gen: v7x
topology: tpu7x:2x2x1
jax: 0.10.0
libtpu: 0.0.40
codegen_flags: <defaults>
</compile_context>

<pallas_src>
import functools

import numpy as np
import jax
import jax.numpy as jnp
from jax.experimental import pallas as pl
from jax.experimental.pallas import tpu as pltpu


def _make_weights_np() -> np.ndarray:
    """Deterministic 68-entry weight buffer identical to the PyTorch __init__."""
    w = np.ones((68,), dtype=np.float32)
    w[5:7] = 2.0
    w[10:12] = 2.0
    w[27:36] = 1.5
    w[30] = 3.0
    w[31] = 3.0
    w[35] = 3.0
    w[60:68] = 1.5
    w[48:60] = 1.5
    w[48] = 3.0
    w[54] = 3.0
    return w


_W68 = _make_weights_np()

_TILE_B_MAX = 2048  # 2 inputs x 2 buffers x 2048 x 256 lanes x 4B = 8 MiB (fits v5e scoped VMEM)


def _round_up(x: int, m: int) -> int:
    return ((x + m - 1) // m) * m


def _cdiv(a: int, b: int) -> int:
    return -(-a // b)


def _choose_tile_b(B: int) -> int:
    if B <= 8:
        # Block equals the full batch dim -> exempt from the 8-row rule.
        return B
    if B <= 1024:
        # One tile: data is tiny, single grid step has the lowest overhead.
        return _round_up(B, 8)
    # Large B: at least 2 real tiles so v7x megacore can shard the parallel
    # axis; cap so double-buffered inputs stay within v5e's default scoped VMEM.
    return min(_TILE_B_MAX, _round_up(_cdiv(B, 2), 8))


def _kp_loss_kernel(pred_ref, kp_ref, w_ref, o_ref, *, tile_b: int,
                    batch: int, need_mask: bool):
    # pred_ref / kp_ref: (TILE_B, K*D) in VMEM; w_ref: (1, K*D) in VMEM.
    # w already folds 1/D, 1/sum(w) and 1/B, so this tile's partial loss is
    # sum_rows(|pred - kp|) . w  (masked rows contribute 0).
    diff = jnp.abs(pred_ref[...].astype(jnp.float32)
                   - kp_ref[...].astype(jnp.float32))          # (TILE_B, KD)
    if need_mask:
        # Ragged last tile: rows past the true batch hold unspecified data.
        row = jax.lax.broadcasted_iota(jnp.int32, (tile_b, 1), 0)
        valid = (pl.program_id(0) * tile_b + row) < batch
        diff = jnp.where(valid, diff, 0.0)
    row_sums = jnp.sum(diff, axis=0, keepdims=True)             # (1, KD)
    o_ref[0, 0] = jnp.sum(row_sums * w_ref[...])                # scalar partial


def keypoints_matching_loss(pred_keypoints: jnp.ndarray,
                            keypoints: jnp.ndarray) -> jnp.ndarray:
    assert pred_keypoints.shape == keypoints.shape
    B, K, D = pred_keypoints.shape
    assert K == 68, "KeypointsMatchingLoss expects 68 keypoints"
    KD = K * D

    # Fold mean-over-D, weight normalization and batch mean into one constant
    # (1, K*D) row baked at trace time: w_flat[k*D + d] = w[k] / (D*sum(w)*B).
    w_flat_np = (np.repeat(_W68, D) / (D * _W68.sum() * B)).astype(np.float32)
    w_flat = jnp.asarray(w_flat_np.reshape(1, KD))

    # Lane-dense (B, K*D) views — no batch padding, no HBM copies.
    pred2d = pred_keypoints.reshape(B, KD)
    kp2d = keypoints.reshape(B, KD)

    tile_b = _choose_tile_b(B)
    num_tiles = _cdiv(B, tile_b)
    need_mask = (B % tile_b) != 0

    kernel = functools.partial(_kp_loss_kernel, tile_b=tile_b, batch=B,
                               need_mask=need_mask)

    partials = pl.pallas_call(
        kernel,
        out_shape=jax.ShapeDtypeStruct((num_tiles, 1), jnp.float32),
        grid=(num_tiles,),
        in_specs=[
            pl.BlockSpec((tile_b, KD), lambda i: (i, 0)),
            pl.BlockSpec((tile_b, KD), lambda i: (i, 0)),
            pl.BlockSpec((1, KD), lambda i: (0, 0)),
        ],
        out_specs=pl.BlockSpec((1, 1), lambda i: (i, 0),
                               memory_space=pltpu.MemorySpace.SMEM),
        compiler_params=pltpu.CompilerParams(
            dimension_semantics=("parallel",)),
    )(pred2d, kp2d, w_flat)

    # Tiny finalize outside the kernel (num_tiles scalars).
    return jnp.sum(partials)


def _reference(pred_keypoints, keypoints):
    w = jnp.asarray(_W68)
    diff = jnp.abs(pred_keypoints.astype(jnp.float32)
                   - keypoints.astype(jnp.float32))
    return jnp.mean(jnp.sum(jnp.mean(diff, -1) * w[None] / jnp.sum(w), -1))


if __name__ == "__main__":
    key = jax.random.PRNGKey(0)
    k1, k2, k3, k4 = jax.random.split(key, 4)
    K, D = 68, 3

    # Primary small check: batch=2, 68 facial keypoints, 3-D coordinates.
    B = 2
    pred = jax.random.normal(k1, (B, K, D), dtype=jnp.float32)
    gt = jax.random.normal(k2, (B, K, D), dtype=jnp.float32)
    loss = keypoints_matching_loss(pred, gt)
    jax.block_until_ready(loss)
    ref = _reference(pred, gt)
    assert jnp.allclose(loss, ref, rtol=1e-5, atol=1e-6), (loss, ref)

    # Secondary check: exercises multi-tile grid + ragged-last-tile masking.
    B2 = 2500
    pred2 = jax.random.normal(k3, (B2, K, D), dtype=jnp.float32)
    gt2 = jax.random.normal(k4, (B2, K, D), dtype=jnp.float32)
    loss2 = keypoints_matching_loss(pred2, gt2)
    jax.block_until_ready(loss2)
    ref2 = _reference(pred2, gt2)
    assert jnp.allclose(loss2, ref2, rtol=1e-5, atol=1e-6), (loss2, ref2)

    print("KERNEL_OK")
</pallas_src>

<mosaic_0001>
module attributes {stable_mosaic.version = 11 : i64} {
  func.func @_kp_loss_kernel(%arg0: i32, %arg1: memref<2x204xf32, #tpu.memory_space<vmem>>, %arg2: memref<2x204xf32, #tpu.memory_space<vmem>>, %arg3: memref<1x204xf32, #tpu.memory_space<vmem>>, %arg4: memref<1x1xf32, #tpu.memory_space<smem>>) attributes {dimension_semantics = [#tpu.dimension_semantics<parallel>], iteration_bounds = array<i64: 1>, scalar_prefetch = 0 : i64, scratch_operands = 0 : i64, tpu.core_type = #tpu.core_type<tc>, window_params = [{transform_indices = @transform_0, window_bounds = array<i64: 2, 204>}, {transform_indices = @transform_1, window_bounds = array<i64: 2, 204>}, {pipeline_mode = #tpu.pipeline_mode<synchronous>, transform_indices = @transform_2, window_bounds = array<i64: 1, 204>}, {transform_indices = @transform_3, window_bounds = array<i64: 1, 1>}]} {
    %c0 = arith.constant 0 : index
    %c0_0 = arith.constant 0 : index
    %0 = vector.load %arg1[%c0, %c0_0] : memref<2x204xf32, #tpu.memory_space<vmem>>, vector<2x204xf32>
    %c0_1 = arith.constant 0 : index
    %c0_2 = arith.constant 0 : index
    %1 = vector.load %arg2[%c0_1, %c0_2] : memref<2x204xf32, #tpu.memory_space<vmem>>, vector<2x204xf32>
    %2 = arith.subf %0, %1 : vector<2x204xf32>
    %3 = math.absf %2 : vector<2x204xf32>
    %cst = arith.constant dense<0.000000e+00> : vector<204xf32>
    %4 = vector.multi_reduction <add>, %3, %cst [0] : vector<2x204xf32> to vector<204xf32>
    %5 = vector.shape_cast %4 : vector<204xf32> to vector<1x204xf32>
    %c0_3 = arith.constant 0 : index
    %c0_4 = arith.constant 0 : index
    %6 = vector.load %arg3[%c0_3, %c0_4] : memref<1x204xf32, #tpu.memory_space<vmem>>, vector<1x204xf32>
    %7 = arith.mulf %5, %6 : vector<1x204xf32>
    %8 = vector.shape_cast %7 : vector<1x204xf32> to vector<1x1x204xf32>
    %cst_5 = arith.constant dense<0.000000e+00> : vector<1xf32>
    %9 = vector.multi_reduction <add>, %8, %cst_5 [1, 2] : vector<1x1x204xf32> to vector<1xf32>
    %10 = vector.shape_cast %9 : vector<1xf32> to vector<1x1x1xf32>
    %11 = vector.extract %10[0, 0, 0] : f32 from vector<1x1x1xf32>
    %c0_6 = arith.constant 0 : index
    %c0_7 = arith.constant 0 : index
    %12 = memref.load %arg4[%c0_6, %c0_7] : memref<1x1xf32, #tpu.memory_space<smem>>
    memref.store %11, %arg4[%c0_6, %c0_7] : memref<1x1xf32, #tpu.memory_space<smem>>
    return
  }
  func.func @transform_0(%arg0: i32) -> (i32, i32) {
    %c0_i32 = arith.constant 0 : i32
    %c0_i32_0 = arith.constant 0 : i32
    return %arg0, %c0_i32 : i32, i32
  }
  func.func @transform_1(%arg0: i32) -> (i32, i32) {
    %c0_i32 = arith.constant 0 : i32
    %c0_i32_0 = arith.constant 0 : i32
    return %arg0, %c0_i32 : i32, i32
  }
  func.func @transform_2(%arg0: i32) -> (i32, i32) {
    %c0_i32 = arith.constant 0 : i32
    %c0_i32_0 = arith.constant 0 : i32
    %c0_i32_1 = arith.constant 0 : i32
    return %c0_i32, %c0_i32_0 : i32, i32
  }
  func.func @transform_3(%arg0: i32) -> (i32, i32) {
    %c0_i32 = arith.constant 0 : i32
    %c0_i32_0 = arith.constant 0 : i32
    return %arg0, %c0_i32 : i32, i32
  }
}

</mosaic_0001>

<bundles_post_ra>
// kernel: tpu_custom_call.1
= control target key start
LH: loop header
LB: loop body
LE: loop exit
PB: predicated region body
PF: predicated region fallthrough
CT: control target
= control target key end

     0   :  { %8 = vsyncpa [#allocation3], 0  ;;  %s244_s0 = inlined_call_operand.hbm [shape: f32[2,204], index: 0, kind: input, shape index: {}]   ;;  %s245_s1 = inlined_call_operand.hbm [shape: f32[2,204], index: 1, kind: input, shape index: {}]   ;;  %s246_s2 = inlined_call_operand.vmem [shape: f32[1,204], index: 2, kind: input, shape index: {}]   ;;  %s247_s3 = inlined_call_operand.hbm [shape: f32[1,1], index: 3, kind: output, shape index: {}]  }
   0x1   :  { %9 = vsyncpa [#allocation6], 0 }
   0x2   :  { %10 = vsyncpa [#allocation4], 0  ;;  %s181_s12 = smov [#allocation2]   ;;  %s182_s14 = smov [#allocation5]  }
   0x3   :  { %s17_s13 = sshll.u32 %s181_s12, 4  ;;  %s27_s15 = sshll.u32 %s182_s14, 4  ;;  %s18_s13 = int_to_ptr.vmem [resolvable:$true] %s17_s13  ;;  %s28_s15 = int_to_ptr.vmem [resolvable:$true] %s27_s15 }
   0x4   :  { %s121_s18 = scalar_lea.hbm %s244_s0, 64 }
   0x5   :  { %p122_p0 = scmp.ne.s32.totalorder %s244_s0, %s121_s18  ;;  %p125_p1 = scmp.lt.u32.totalorder %s121_s18, %s244_s0 }
   0x7   :  { %p127_p2 = pnand %p125_p1, %p122_p0 }
   0x9   :  { %130 = shalt.err (!%p127_p2)
}
   0xa   :  { %s131_s23 = scalar_lea.vmem %s18_s13, 64  ;;  %p136_p4 = scmp.lt.s32.totalorder %s18_s13, %s18_s13 }
   0xb   :  { %p132_p3 = scmp.ne.s32.totalorder %s18_s13, %s131_s23  ;;  %p137_p5 = scmp.lt.s32.totalorder %s131_s23, %s131_s23 }
   0xd   :  { %p138_p6 = por %p137_p5, %p136_p4 }
   0xf   :  { %p139_p7 = pnand %p138_p6, %p132_p3 }
  0x11   :  { %142 = shalt.err (!%p139_p7)
}
  0x12   :  { %20 = dma.hbm_to_vmem [thread:$0]  %s244_s0, 64, %s18_s13, [#allocation3]  }
  0x13   :  { %s143_s28 = scalar_lea.hbm %s245_s1, 64 }
  0x14   :  { %p144_p8 = scmp.ne.s32.totalorder %s245_s1, %s143_s28  ;;  %p147_p9 = scmp.lt.u32.totalorder %s143_s28, %s245_s1 }
  0x16   :  { %p149_p10 = pnand %p147_p9, %p144_p8 }
  0x18   :  { %152 = shalt.err (!%p149_p10)
}
  0x19   :  { %s153_s6 = scalar_lea.vmem %s28_s15, 64  ;;  %p158_p12 = scmp.lt.s32.totalorder %s28_s15, %s28_s15 }
  0x1a   :  { %p154_p11 = scmp.ne.s32.totalorder %s28_s15, %s153_s6  ;;  %p159_p13 = scmp.lt.s32.totalorder %s153_s6, %s153_s6 }
  0x1c   :  { %p160_p0 = por %p159_p13, %p158_p12 }
  0x1e   :  { %p161_p1 = pnand %p160_p0, %p154_p11 }
  0x20   :  { %164 = shalt.err (!%p161_p1)
}
  0x21   :  { %30 = dma.hbm_to_vmem [thread:$0]  %s245_s1, 64, %s28_s15, [#allocation6]  }
  0x22   :  { %175 = dma.done.wait [#allocation3], 64  }
  0x23   :  { %176 = vsyncadd [#allocation3], 4294967232 }
  0x24   :  { %177 = dma.done.wait [#allocation6], 64  }
  0x25   :  { %178 = vsyncadd [#allocation6], 4294967232  ;;  %v47_v0 = vlaneseq  ;;  %v183_v1 = vmov 1983009808   ;;  %v39_v5 = vld [vmem:[#allocation2] sm:$0xf] }
  0x26   :  { %v45_v2 = vunpack.c.l.s4 %v183_v1  ;;  %v40_v6 = vld [vmem:[#allocation5] sm:$0xf]  ;;  %vm54_vm0 = vcmask 1041408   ;;  %vm62_vm1 = vcmask 615424   ;;  %v70_v20 = vld [vmem:[%s246_s2] sm:$0x3] }
  0x27   :  { %v48_v4 = vshrl.u32 %v47_v0, 7  ;;  %v41_v7 = vsub.f32 %v39_v5, %v40_v6  ;;  %vm84_vm2 = vcmask 1040384   ;;  %vm86_vm3 = vcmask 614400   ;;  %s165_s11 = scalar_lea.hbm %s247_s3, 16 }
  0x28   :  { %v46_v3 = vunpack.c.0.s8 %v45_v2  ;;  %p166_p2 = scmp.ne.s32.totalorder %s247_s3, %s165_s11  ;;  %p169_p3 = scmp.lt.u32.totalorder %s165_s11, %s247_s3 }
  0x29   :  { %v42_v9 = vand.u32 2147483647, %v41_v7  ;;  %v74_v19 = vsub.s32 0, %v48_v4  ;;  %v78_v23 = vsub.s32 1, %v48_v4 }
  0x2a   :  { %v49_v8 = vsub.s32 %v46_v3, %v48_v4  ;;  %p171_p4 = pnand %p169_p3, %p166_p2 }
  0x2b   :  { %v75_v26 = vrot.slane %v70_v20, %v74_v19  ;;  %v79_v29 = vrot.slane %v70_v20, %v78_v23 }
  0x2c   :  { %v50_v10 = vrot.slane %v42_v9, %v49_v8 }
  0x2e   :  { %v51_v11 = vcombine.high %v50_v10, %v50_v10  ;;  %v55_v12 = vsel %vm54_vm0, %v50_v10, 0.0 }
  0x2f   :  { %v56_v13 = vrot.slane %v55_v12, 4 }
  0x30   :  { %v63_v14 = vsel %vm62_vm1, %v51_v11, 0.0 }
  0x31   :  { %v57_v15 = vadd.f32 %v56_v13, %v55_v12  ;;  %v64_v16 = vrot.slane %v63_v14, 4 }
  0x33   :  { %v58_v17 = vrot.slane %v57_v15, 2  ;;  %v65_v18 = vadd.f32 %v64_v16, %v63_v14 }
  0x35   :  { %v59_v21 = vadd.f32 %v58_v17, %v57_v15  ;;  %v66_v22 = vrot.slane %v65_v18, 2 }
  0x37   :  { %v60_v24 = vrot.slane %v59_v21, 1  ;;  %v67_v25 = vadd.f32 %v66_v22, %v65_v18 }
  0x39   :  { %v61_v27 = vadd.f32 %v60_v24, %v59_v21  ;;  %v68_v28 = vrot.slane %v67_v25, 1 }
  0x3b   :  { %v69_v30 = vadd.f32 %v68_v28, %v67_v25  ;;  %v82_v31 = vmul.f32 %v75_v26, %v61_v27 }
  0x3d   :  { %v83_v32 = vmul.f32 %v79_v29, %v69_v30  ;;  %v85_v33 = vsel %vm84_vm2, %v82_v31, 0.0 }
  0x3f   :  { %v87_v34 = vsel %vm86_vm3, %v83_v32, 0.0 }
  0x40   :  { %v88_v35 = vadd.f32 %v87_v34, %v85_v33 }
  0x42   :  { %89 = vadd.xlane.f32.xlu0 %v88_v35 }
  0xcf   :  { %v90_v36 = vpop.xlane.xlu0 %89 }
  0xd0   :  { %v91_v37 = vrot.slane %v90_v36, 4 }
  0xd2   :  { %v92_v38 = vadd.f32 %v91_v37, %v90_v36 }
  0xd4   :  { %v93_v39 = vrot.slane %v92_v38, 2 }
  0xd6   :  { %v94_v40 = vadd.f32 %v93_v39, %v92_v38 }
  0xd8   :  { %v95_v41 = vrot.slane %v94_v40, 1 }
  0xda   :  { %v96_v42 = vadd.f32 %v95_v41, %v94_v40 }
  0xdc   :  { %115 = vpush %v96_v42 }
 0x10d   :  { %s116_s2 = spop %115 }
 0x10e   :  { %99 = sst [smem:[#allocation7]] %s116_s2 }
 0x10f   :  { %174 = shalt.err (!%p171_p4)
}
 0x110   :  { %s184_s16 = smov [#allocation7]  }
 0x111   :  { %107 = dma.smem_to_hbm %s184_s16, 16, %s247_s3, [#allocation4]  }
 0x112   :  { %179 = dma.done.wait [#allocation4], 16  }
 0x113   :  { %180 = vsyncadd [#allocation4], 4294967280 }
 0x114   :  { %111 = sfence }
 0x115   :  { %112 = vsyncpa [#allocation3], 1 }
 0x116   :  { %113 = vsyncpa [#allocation6], 1 }
 0x117   :  { %114 = vsyncpa [#allocation4], 1 }

</bundles_post_ra>
